<compile_context>
chip_gen: v5e
topology: v5e:2x2
jax: 0.10.0
libtpu: 0.0.40
codegen_flags: <defaults>
</compile_context>

<pallas_src>
import jax
import jax.numpy as jnp
from jax.experimental import pallas as pl
from jax.experimental.pallas import tpu as pltpu


def _vrptw_embed_kernel(locs_ref, tw_ref, dem_ref, dur_ref, mask_ref,
                        w_xy_ref, w_tw_ref, w_dm_ref, w_du_ref,
                        w_dep_ref, b_node_ref, b_dep_ref,
                        out_ref):
    # Row block over flattened (batch, node) rows; depot rows recur every N+1 rows.
    locs = locs_ref[...]          # (RB, 2)  node x, y
    tw = tw_ref[...]              # (RB, 2)  time-window start/end
    dem = dem_ref[...]            # (RB, 1)  demand (0.0 on depot rows)
    dur = dur_ref[...]            # (RB, 1)  duration
    m = mask_ref[...]             # (RB, 1)  1.0 on depot rows, else 0.0

    # Customer-style embedding for every row:
    #   the two K=2 pieces go to the MXU, the scalar features + bias are VPU FMAs.
    node = jnp.dot(locs, w_xy_ref[...], preferred_element_type=jnp.float32)
    node = node + jnp.dot(tw, w_tw_ref[...], preferred_element_type=jnp.float32)
    node = node + dem * w_dm_ref[...]
    node = node + dur * w_du_ref[...]
    node = node + b_node_ref[...]

    # Depot-style embedding for every row (cheap K=2 matmul + bias); selected only
    # on depot rows below.
    dep = jnp.dot(locs, w_dep_ref[...], preferred_element_type=jnp.float32)
    dep = dep + b_dep_ref[...]

    out_ref[...] = jnp.where(m > 0.5, dep, node).astype(out_ref.dtype)


def _pick_row_block(n_rows, embed_dim, vmem_out_budget=4 * 1024 * 1024):
    """Largest row block <=1024 that divides n_rows, is a multiple of 8, and keeps
    one output buffer under ~4 MiB (so double-buffered tiles fit scoped VMEM on
    v5e/v6e/v7x). Falls back to a single full-size block for small/odd row counts."""
    for rb in (1024, 512, 256, 128, 64, 32, 16, 8):
        if n_rows % rb == 0 and rb * embed_dim * 4 <= vmem_out_budget:
            return rb
    return n_rows


def vrptw_init_embedding(locs, demand, time_windows, durations, params):
    """JAX wrapper reproducing VRPTWInitEmbedding.forward semantics."""
    B, Np1, _ = locs.shape
    D = params["w_node"].shape[1]
    R = B * Np1
    dtype = locs.dtype

    # Flatten (batch, node) into rows — free reshapes, arrays are contiguous.
    locs_f = locs.reshape(R, 2)
    tw_f = time_windows.reshape(R, 2)
    dur_f = durations.reshape(R, 1)
    # Align demand with the node axis (zero on depot rows): tiny [B,1] pad instead
    # of materializing a [B, N, 6] feature tensor in HBM.
    dem_f = jnp.concatenate(
        [jnp.zeros((B, 1), demand.dtype), demand], axis=1).reshape(R, 1)
    # Depot mask: 1.0 at row 0 of every batch element.
    mask_f = (jnp.arange(R, dtype=jnp.int32) % Np1 == 0).astype(dtype).reshape(R, 1)

    # Weights stored [in, out] so the kernel does x @ W; pre-slice the node weight
    # rows once in the wrapper (constant-sized, negligible) to avoid per-step
    # unaligned sublane slicing inside the kernel.
    w_node = params["w_node"]                  # (6, D)
    w_xy = w_node[0:2]                         # x, y
    w_dm = w_node[2:3]                         # demand
    w_tw = w_node[3:5]                         # tw start/end
    w_du = w_node[5:6]                         # duration
    w_dep = params["w_dep"]                    # (2, D)
    b_node = params["b_node"].reshape(1, D)
    b_dep = params["b_dep"].reshape(1, D)

    RB = _pick_row_block(R, D)
    grid = (R // RB,)

    row_spec2 = pl.BlockSpec((RB, 2), lambda r: (r, 0))
    row_spec1 = pl.BlockSpec((RB, 1), lambda r: (r, 0))

    def const_spec(shape):
        return pl.BlockSpec(shape, lambda r: (0, 0))

    out_f = pl.pallas_call(
        _vrptw_embed_kernel,
        out_shape=jax.ShapeDtypeStruct((R, D), dtype),
        grid=grid,
        in_specs=[
            row_spec2,            # locs
            row_spec2,            # time windows
            row_spec1,            # demand (padded)
            row_spec1,            # durations
            row_spec1,            # depot mask
            const_spec((2, D)),   # w_xy
            const_spec((2, D)),   # w_tw
            const_spec((1, D)),   # w_dm
            const_spec((1, D)),   # w_du
            const_spec((2, D)),   # w_dep
            const_spec((1, D)),   # b_node
            const_spec((1, D)),   # b_dep
        ],
        out_specs=pl.BlockSpec((RB, D), lambda r: (r, 0)),
        compiler_params=pltpu.CompilerParams(
            dimension_semantics=("parallel",)),
    )(locs_f, tw_f, dem_f, dur_f, mask_f,
      w_xy, w_tw, w_dm, w_du, w_dep, b_node, b_dep)

    return out_f.reshape(B, Np1, D)


def _reference(locs, demand, time_windows, durations, params):
    depot = locs[:, :1, :]
    cities = locs[:, 1:, :]
    tw = time_windows[:, 1:, :]
    dur = durations[:, 1:]
    feat = jnp.concatenate([cities, demand[..., None], tw, dur[..., None]], -1)
    dep_emb = depot @ params["w_dep"] + params["b_dep"]
    node_emb = feat @ params["w_node"] + params["b_node"]
    return jnp.concatenate([dep_emb, node_emb], axis=-2)


def init_params(key, embed_dim, node_dim=6):
    """Deterministic init mirroring nn.Linear default (uniform +-1/sqrt(fan_in)).
    Weights stored pre-transposed as [in, out] so the kernel does x @ W."""
    k1, k2, k3, k4 = jax.random.split(key, 4)
    bn = 1.0 / jnp.sqrt(node_dim)
    bd = 1.0 / jnp.sqrt(2.0)
    return {
        "w_node": jax.random.uniform(k1, (node_dim, embed_dim), jnp.float32, -bn, bn),
        "b_node": jax.random.uniform(k2, (embed_dim,), jnp.float32, -bn, bn),
        "w_dep": jax.random.uniform(k3, (2, embed_dim), jnp.float32, -bd, bd),
        "b_dep": jax.random.uniform(k4, (embed_dim,), jnp.float32, -bd, bd),
    }


def _make_inputs(key, B, N):
    k_locs, k_dem, k_tw, k_dur = jax.random.split(key, 4)
    locs = jax.random.uniform(k_locs, (B, N + 1, 2), jnp.float32)
    demand = jax.random.uniform(k_dem, (B, N), jnp.float32)
    tw_start = jax.random.uniform(k_tw, (B, N + 1, 1), jnp.float32)
    time_windows = jnp.concatenate([tw_start, tw_start + 0.5], axis=-1)
    durations = jax.random.uniform(k_dur, (B, N + 1), jnp.float32) * 0.1
    return locs, demand, time_windows, durations


if __name__ == "__main__":
    key = jax.random.PRNGKey(0)
    kp, k_small, k_big = jax.random.split(key, 3)

    # Small shapes consistent with the module (single-block path).
    B, N, D = 2, 8, 32
    params = init_params(kp, D)
    inputs = _make_inputs(k_small, B, N)
    out = jax.block_until_ready(vrptw_init_embedding(*inputs, params))
    ref = _reference(*inputs, params)
    assert out.shape == (B, N + 1, D), out.shape
    assert jnp.allclose(out, ref, atol=1e-5, rtol=1e-5), "mismatch vs reference (small)"

    # Slightly larger case: exercises the multi-block row pipeline (grid > 1) and
    # the lane-dense (D=128) output path; depot rows land mid-block here.
    B2, N2, D2 = 16, 49, 128
    params2 = init_params(jax.random.fold_in(kp, 1), D2)
    inputs2 = _make_inputs(k_big, B2, N2)
    out2 = jax.block_until_ready(vrptw_init_embedding(*inputs2, params2))
    ref2 = _reference(*inputs2, params2)
    assert out2.shape == (B2, N2 + 1, D2), out2.shape
    assert jnp.allclose(out2, ref2, atol=1e-5, rtol=1e-5), "mismatch vs reference (large)"

    print("KERNEL_OK")
</pallas_src>

<mosaic_0001>
module attributes {stable_mosaic.version = 11 : i64} {
  func.func @_vrptw_embed_kernel(%arg0: i32, %arg1: memref<18x2xf32, #tpu.memory_space<vmem>>, %arg2: memref<18x2xf32, #tpu.memory_space<vmem>>, %arg3: memref<18x1xf32, #tpu.memory_space<vmem>>, %arg4: memref<18x1xf32, #tpu.memory_space<vmem>>, %arg5: memref<18x1xf32, #tpu.memory_space<vmem>>, %arg6: memref<2x32xf32, #tpu.memory_space<vmem>>, %arg7: memref<2x32xf32, #tpu.memory_space<vmem>>, %arg8: memref<1x32xf32, #tpu.memory_space<vmem>>, %arg9: memref<1x32xf32, #tpu.memory_space<vmem>>, %arg10: memref<2x32xf32, #tpu.memory_space<vmem>>, %arg11: memref<1x32xf32, #tpu.memory_space<vmem>>, %arg12: memref<1x32xf32, #tpu.memory_space<vmem>>, %arg13: memref<18x32xf32, #tpu.memory_space<vmem>>) attributes {dimension_semantics = [#tpu.dimension_semantics<parallel>], iteration_bounds = array<i64: 1>, scalar_prefetch = 0 : i64, scratch_operands = 0 : i64, tpu.core_type = #tpu.core_type<tc>, window_params = [{transform_indices = @transform_0, window_bounds = array<i64: 18, 2>}, {transform_indices = @transform_1, window_bounds = array<i64: 18, 2>}, {transform_indices = @transform_2, window_bounds = array<i64: 18, 1>}, {transform_indices = @transform_3, window_bounds = array<i64: 18, 1>}, {transform_indices = @transform_4, window_bounds = array<i64: 18, 1>}, {pipeline_mode = #tpu.pipeline_mode<synchronous>, transform_indices = @transform_5, window_bounds = array<i64: 2, 32>}, {pipeline_mode = #tpu.pipeline_mode<synchronous>, transform_indices = @transform_6, window_bounds = array<i64: 2, 32>}, {pipeline_mode = #tpu.pipeline_mode<synchronous>, transform_indices = @transform_7, window_bounds = array<i64: 1, 32>}, {pipeline_mode = #tpu.pipeline_mode<synchronous>, transform_indices = @transform_8, window_bounds = array<i64: 1, 32>}, {pipeline_mode = #tpu.pipeline_mode<synchronous>, transform_indices = @transform_9, window_bounds = array<i64: 2, 32>}, {pipeline_mode = #tpu.pipeline_mode<synchronous>, transform_indices = @transform_10, window_bounds = array<i64: 1, 32>}, {pipeline_mode = #tpu.pipeline_mode<synchronous>, transform_indices = @transform_11, window_bounds = array<i64: 1, 32>}, {transform_indices = @transform_12, window_bounds = array<i64: 18, 32>}]} {
    %c0 = arith.constant 0 : index
    %c0_0 = arith.constant 0 : index
    %0 = vector.load %arg1[%c0, %c0_0] : memref<18x2xf32, #tpu.memory_space<vmem>>, vector<18x2xf32>
    %c0_1 = arith.constant 0 : index
    %c0_2 = arith.constant 0 : index
    %1 = vector.load %arg2[%c0_1, %c0_2] : memref<18x2xf32, #tpu.memory_space<vmem>>, vector<18x2xf32>
    %c0_3 = arith.constant 0 : index
    %c0_4 = arith.constant 0 : index
    %2 = vector.load %arg3[%c0_3, %c0_4] : memref<18x1xf32, #tpu.memory_space<vmem>>, vector<18x1xf32>
    %c0_5 = arith.constant 0 : index
    %c0_6 = arith.constant 0 : index
    %3 = vector.load %arg4[%c0_5, %c0_6] : memref<18x1xf32, #tpu.memory_space<vmem>>, vector<18x1xf32>
    %c0_7 = arith.constant 0 : index
    %c0_8 = arith.constant 0 : index
    %4 = vector.load %arg5[%c0_7, %c0_8] : memref<18x1xf32, #tpu.memory_space<vmem>>, vector<18x1xf32>
    %c0_9 = arith.constant 0 : index
    %c0_10 = arith.constant 0 : index
    %5 = vector.load %arg6[%c0_9, %c0_10] : memref<2x32xf32, #tpu.memory_space<vmem>>, vector<2x32xf32>
    %cst = arith.constant dense<0.000000e+00> : vector<18x32xf32>
    %6 = tpu.matmul %0, %5, %cst {dimension_numbers = #tpu.dot_dimension_numbers<[1], [0], [0], [1], [0, 0, 1, 1], [], []>} : vector<18x2xf32>, vector<2x32xf32>, vector<18x32xf32> -> vector<18x32xf32>
    %c0_11 = arith.constant 0 : index
    %c0_12 = arith.constant 0 : index
    %7 = vector.load %arg7[%c0_11, %c0_12] : memref<2x32xf32, #tpu.memory_space<vmem>>, vector<2x32xf32>
    %cst_13 = arith.constant dense<0.000000e+00> : vector<18x32xf32>
    %8 = tpu.matmul %1, %7, %cst_13 {dimension_numbers = #tpu.dot_dimension_numbers<[1], [0], [0], [1], [0, 0, 1, 1], [], []>} : vector<18x2xf32>, vector<2x32xf32>, vector<18x32xf32> -> vector<18x32xf32>
    %9 = arith.addf %6, %8 : vector<18x32xf32>
    %c0_14 = arith.constant 0 : index
    %c0_15 = arith.constant 0 : index
    %10 = vector.load %arg8[%c0_14, %c0_15] : memref<1x32xf32, #tpu.memory_space<vmem>>, vector<1x32xf32>
    %11 = vector.broadcast %2 : vector<18x1xf32> to vector<18x32xf32>
    %12 = vector.broadcast %10 : vector<1x32xf32> to vector<18x32xf32>
    %13 = arith.mulf %11, %12 : vector<18x32xf32>
    %14 = arith.addf %9, %13 : vector<18x32xf32>
    %c0_16 = arith.constant 0 : index
    %c0_17 = arith.constant 0 : index
    %15 = vector.load %arg9[%c0_16, %c0_17] : memref<1x32xf32, #tpu.memory_space<vmem>>, vector<1x32xf32>
    %16 = vector.broadcast %3 : vector<18x1xf32> to vector<18x32xf32>
    %17 = vector.broadcast %15 : vector<1x32xf32> to vector<18x32xf32>
    %18 = arith.mulf %16, %17 : vector<18x32xf32>
    %19 = arith.addf %14, %18 : vector<18x32xf32>
    %c0_18 = arith.constant 0 : index
    %c0_19 = arith.constant 0 : index
    %20 = vector.load %arg11[%c0_18, %c0_19] : memref<1x32xf32, #tpu.memory_space<vmem>>, vector<1x32xf32>
    %21 = vector.broadcast %20 : vector<1x32xf32> to vector<18x32xf32>
    %22 = arith.addf %19, %21 : vector<18x32xf32>
    %c0_20 = arith.constant 0 : index
    %c0_21 = arith.constant 0 : index
    %23 = vector.load %arg10[%c0_20, %c0_21] : memref<2x32xf32, #tpu.memory_space<vmem>>, vector<2x32xf32>
    %cst_22 = arith.constant dense<0.000000e+00> : vector<18x32xf32>
    %24 = tpu.matmul %0, %23, %cst_22 {dimension_numbers = #tpu.dot_dimension_numbers<[1], [0], [0], [1], [0, 0, 1, 1], [], []>} : vector<18x2xf32>, vector<2x32xf32>, vector<18x32xf32> -> vector<18x32xf32>
    %c0_23 = arith.constant 0 : index
    %c0_24 = arith.constant 0 : index
    %25 = vector.load %arg12[%c0_23, %c0_24] : memref<1x32xf32, #tpu.memory_space<vmem>>, vector<1x32xf32>
    %26 = vector.broadcast %25 : vector<1x32xf32> to vector<18x32xf32>
    %27 = arith.addf %24, %26 : vector<18x32xf32>
    %cst_25 = arith.constant 5.000000e-01 : f32
    %28 = vector.broadcast %cst_25 : f32 to vector<18x1xf32>
    %29 = arith.cmpf ogt, %4, %28 : vector<18x1xf32>
    %30 = vector.shape_cast %29 : vector<18x1xi1> to vector<18x1xi1>
    %31 = vector.broadcast %30 : vector<18x1xi1> to vector<18x32xi1>
    %32 = arith.select %31, %27, %22 : vector<18x32xi1>, vector<18x32xf32>
    %c0_26 = arith.constant 0 : index
    %c0_27 = arith.constant 0 : index
    %33 = vector.load %arg13[%c0_26, %c0_27] : memref<18x32xf32, #tpu.memory_space<vmem>>, vector<18x32xf32>
    tpu.vector_store %arg13[%c0_26, %c0_27], %32 {strides = array<i32>} : memref<18x32xf32, #tpu.memory_space<vmem>>, vector<18x32xf32>,
    return
  }
  func.func @transform_0(%arg0: i32) -> (i32, i32) {
    %c0_i32 = arith.constant 0 : i32
    %c0_i32_0 = arith.constant 0 : i32
    return %arg0, %c0_i32 : i32, i32
  }
  func.func @transform_1(%arg0: i32) -> (i32, i32) {
    %c0_i32 = arith.constant 0 : i32
    %c0_i32_0 = arith.constant 0 : i32
    return %arg0, %c0_i32 : i32, i32
  }
  func.func @transform_2(%arg0: i32) -> (i32, i32) {
    %c0_i32 = arith.constant 0 : i32
    %c0_i32_0 = arith.constant 0 : i32
    return %arg0, %c0_i32 : i32, i32
  }
  func.func @transform_3(%arg0: i32) -> (i32, i32) {
    %c0_i32 = arith.constant 0 : i32
    %c0_i32_0 = arith.constant 0 : i32
    return %arg0, %c0_i32 : i32, i32
  }
  func.func @transform_4(%arg0: i32) -> (i32, i32) {
    %c0_i32 = arith.constant 0 : i32
    %c0_i32_0 = arith.constant 0 : i32
    return %arg0, %c0_i32 : i32, i32
  }
  func.func @transform_5(%arg0: i32) -> (i32, i32) {
    %c0_i32 = arith.constant 0 : i32
    %c0_i32_0 = arith.constant 0 : i32
    %c0_i32_1 = arith.constant 0 : i32
    return %c0_i32, %c0_i32_0 : i32, i32
  }
  func.func @transform_6(%arg0: i32) -> (i32, i32) {
    %c0_i32 = arith.constant 0 : i32
    %c0_i32_0 = arith.constant 0 : i32
    %c0_i32_1 = arith.constant 0 : i32
    return %c0_i32, %c0_i32_0 : i32, i32
  }
  func.func @transform_7(%arg0: i32) -> (i32, i32) {
    %c0_i32 = arith.constant 0 : i32
    %c0_i32_0 = arith.constant 0 : i32
    %c0_i32_1 = arith.constant 0 : i32
    return %c0_i32, %c0_i32_0 : i32, i32
  }
  func.func @transform_8(%arg0: i32) -> (i32, i32) {
    %c0_i32 = arith.constant 0 : i32
    %c0_i32_0 = arith.constant 0 : i32
    %c0_i32_1 = arith.constant 0 : i32
    return %c0_i32, %c0_i32_0 : i32, i32
  }
  func.func @transform_9(%arg0: i32) -> (i32, i32) {
    %c0_i32 = arith.constant 0 : i32
    %c0_i32_0 = arith.constant 0 : i32
    %c0_i32_1 = arith.constant 0 : i32
    return %c0_i32, %c0_i32_0 : i32, i32
  }
  func.func @transform_10(%arg0: i32) -> (i32, i32) {
    %c0_i32 = arith.constant 0 : i32
    %c0_i32_0 = arith.constant 0 : i32
    %c0_i32_1 = arith.constant 0 : i32
    return %c0_i32, %c0_i32_0 : i32, i32
  }
  func.func @transform_11(%arg0: i32) -> (i32, i32) {
    %c0_i32 = arith.constant 0 : i32
    %c0_i32_0 = arith.constant 0 : i32
    %c0_i32_1 = arith.constant 0 : i32
    return %c0_i32, %c0_i32_0 : i32, i32
  }
  func.func @transform_12(%arg0: i32) -> (i32, i32) {
    %c0_i32 = arith.constant 0 : i32
    %c0_i32_0 = arith.constant 0 : i32
    return %arg0, %c0_i32 : i32, i32
  }
}

</mosaic_0001>

<bundles_post_ra>
// kernel: tpu_custom_call.1
= control target key start
LH: loop header
LB: loop body
LE: loop exit
PB: predicated region body
PF: predicated region fallthrough
CT: control target
= control target key end

     0   :  { %vm69_vm0 = vcmask 1041408   ;;  %vm59_vm1 = vcmask 15360   ;;  %v322_v8 = vmov 0   ;;  %s475_s0 = inlined_call_operand.vmem [shape: f32[18,2], index: 0, kind: input, shape index: {}]   ;;  %s476_s1 = inlined_call_operand.vmem [shape: f32[18,2], index: 1, kind: input, shape index: {}]   ;;  %s477_s2 = inlined_call_operand.vmem [shape: f32[18,1], index: 2, kind: input, shape index: {}]   ;;  %s478_s3 = inlined_call_operand.vmem [shape: f32[18,1], index: 3, kind: input, shape index: {}]   ;;  %s479_s4 = inlined_call_operand.vmem [shape: f32[18,1], index: 4, kind: input, shape index: {}]   ;;  %s480_s5 = inlined_call_operand.vmem [shape: f32[2,32], index: 5, kind: input, shape index: {}]   ;;  %s481_s6 = inlined_call_operand.vmem [shape: f32[2,32], index: 6, kind: input, shape index: {}]   ;;  %s482_s7 = inlined_call_operand.vmem [shape: f32[1,32], index: 7, kind: input, shape index: {}]   ;;  %s483_s8 = inlined_call_operand.vmem [shape: f32[1,32], index: 8, kind: input, shape index: {}]   ;;  %s484_s9 = inlined_call_operand.vmem [shape: f32[2,32], index: 9, kind: input, shape index: {}]   ;;  %s485_s10 = inlined_call_operand.vmem [shape: f32[1,32], index: 10, kind: input, shape index: {}]   ;;  %s486_s11 = inlined_call_operand.vmem [shape: f32[1,32], index: 11, kind: input, shape index: {}]   ;;  %s487_s12 = inlined_call_operand.hbm [shape: f32[18,32], index: 12, kind: output, shape index: {}]  }
   0x1   :  { %v58_v0 = vld [vmem:[%s481_s6] sm:$0x3]  ;;  %v50_v5 = vld [vmem:[%s477_s2 + $0x10] sm:$0x3]  ;;  %v46_v7 = vld [vmem:[%s476_s1 + $0x8] sm:$0xff]  ;;  %290 = vset.pattern.permute.xlu1 %v322_v8  ;;  %289 = vset.pattern.permute.xlu0 %v322_v8 }
   0x2   :  { %v57_v1 = vld [vmem:[%s480_s5] sm:$0x3]  ;;  %272 = vmatpush.msk.msra.mxu0 %vm69_vm0, %v58_v0  ;;  %284 = vmatpush.msk.msra.mxu3 %vm69_vm0, %v58_v0  ;;  %v52_v9 = vld [vmem:[%s478_s3 + $0x8] sm:$0xff] }
   0x3   :  { %v45_v2 = vld [vmem:[%s476_s1] sm:$0xff]  ;;  %276 = vmatpush.msk.msra.mxu1 %vm69_vm0, %v57_v1  ;;  %150 = vperm.xlu1 %290, %v50_v5   ;;  %v43_v10 = vld [vmem:[%s475_s0 + $0x8] sm:$0xff] }
   0x4   :  { %v194_v3 = vld [vmem:[%s484_s9] sm:$0x3]  ;;  %273 = vmatmul.msk.f32.vlgmr.msra.gmra.mxu0 %vm59_vm1, %v45_v2  ;;  %274 = vmatmul.msk.f32.vlgmr.msra.gmra.mxu3 %vm59_vm1, %v46_v7 }
   0x5   :  { %v42_v4 = vld [vmem:[%s475_s0] sm:$0xff]  ;;  %280 = vmatpush.msk.msra.mxu2 %vm69_vm0, %v194_v3  ;;  %291 = vset.pattern.permute.xlu2 %v322_v8 }
   0x6   :  { %277 = vmatmul.msk.f32.vlgmr.msra.gmra.mxu1 %vm59_vm1, %v42_v4  ;;  %281 = vmatmul.msk.f32.vlgmr.msra.gmra.mxu2 %vm59_vm1, %v42_v4  ;;  %v48_v6 = vld [vmem:[%s477_s2] sm:$0xff] }
   0x7   :  { %140 = vperm.xlu0 %289, %v48_v6   ;;  %170 = vperm.xlu2 %291, %v52_v9  }
   0x8   :  { %17 = vsyncpa [#allocation3], 0  ;;  %v51_v11 = vld [vmem:[%s478_s3] sm:$0xff]  ;;  %v49_v12 = vld [vmem:[%s477_s2 + $0x8] sm:$0xff]  ;;  %vm249_vm5 = vcmask 261120   ;;  %s260_s18 = sshll.u32 %s487_s12, 4  ;;  %s261_s18 = int_to_ptr.hbm [resolvable:$true] %s260_s18 }
   0x9   :  { %v47_v13 = vld [vmem:[%s476_s1 + $0x10] sm:$0x3]  ;;  %v55_v14 = vld [vmem:[%s479_s4 + $0x8] sm:$0xff]  ;;  %v54_v15 = vld [vmem:[%s479_s4] sm:$0xff]  ;;  %vm252_vm8 = vcmask 254976   ;;  %s324_s19 = smov 128  }
   0xa   :  { %v53_v16 = vld [vmem:[%s478_s3 + $0x10] sm:$0x3]  ;;  %vm229_vm2 = vcmp.gt.f32.partialorder %v55_v14, 0.5  ;;  %vm228_vm3 = vcmp.gt.f32.partialorder %v54_v15, 0.5  ;;  %v293_v24 = vld [vmem:[%s482_s7] ss:$0 sm:$0xff] }
   0xb   :  { %165 = vperm.xlu1 %290, %v51_v11   ;;  %v56_v17 = vld [vmem:[%s479_s4 + $0x10] sm:$0x3]  ;;  %v232_v19 = vsel %vm229_vm2, 1, %v322_v8  ;;  %v231_v20 = vsel %vm228_vm3, 1, %v322_v8  ;;  %v292_v25 = vld [vmem:[%s483_s8] ss:$0 sm:$0xff] }
   0xc   :  { %275 = vmatmul.msk.f32.gmra.mxu3 %vm59_vm1, %v47_v13  ;;  %v44_v18 = vld [vmem:[%s475_s0 + $0x10] sm:$0x3]  ;;  %vm230_vm4 = vcmp.gt.f32.partialorder %v56_v17, 0.5  ;;  %v294_v35 = vld [vmem:[%s486_s11] ss:$0 sm:$0xff]  ;;  %s323_s7 = smov [#allocation2]  }
   0xd   :  { %v233_v21 = vsel %vm230_vm4, 1, %v322_v8  ;;  %v295_v36 = vld [vmem:[%s485_s10] ss:$0 sm:$0xff]  ;;  %s258_s8 = sshll.u32 %s323_s7, 4  ;;  %s325_s20 = smov 8   ;;  %s259_s8 = int_to_ptr.vmem [resolvable:$true] %s258_s8 }
   0xe   :  { %278 = vmatmul.msk.f32.gmra.mxu1 %vm59_vm1, %v43_v10  ;;  %282 = vmatmul.msk.f32.gmra.mxu2 %vm59_vm1, %v43_v10 }
   0xf   :  { %145 = vperm.xlu0 %289, %v49_v12   ;;  %175 = vperm.xlu2 %291, %v53_v16  }
  0x13   :  { %238 = vperm.xlu1 %290, %v232_v19  }
  0x16   :  { %279 = vmatmul.msk.f32.gmra.mxu1 %vm59_vm1, %v44_v18  ;;  %283 = vmatmul.msk.f32.gmra.mxu2 %vm59_vm1, %v44_v18 }
  0x17   :  { %235 = vperm.xlu0 %289, %v231_v20   ;;  %241 = vperm.xlu2 %291, %v233_v21  }
  0x61   :  { %v171_v33 = vpop.permute.xlu2 %170 }
  0x62   :  { %v182_v47 = vmul.f32 %v292_v25, %v171_v33 }
  0x69   :  { %v176_v48 = vpop.permute.xlu2 %175 }
  0x6a   :  { %v183_v60 = vmul.f32 %v292_v25, %v176_v48 }
  0x71   :  { %v242_v62 = vpop.permute.xlu2 %241 }
  0x72   :  { %vm245_vm9 = vcmp.eq.s32.totalorder %v242_v62, 1 }
  0x75   :  { %v151_v22 = vpop.permute.xlu1 %150 }
  0x76   :  { %v158_v57 = vmul.f32 %v293_v24, %v151_v22 }
  0x79   :  { %v141_v23 = vpop.permute.xlu0 %140 }
  0x7a   :  { %v156_v26 = vmul.f32 %v293_v24, %v141_v23 }
  0x7d   :  { %v166_v27 = vpop.permute.xlu1 %165 }
  0x7e   :  { %v181_v31 = vmul.f32 %v292_v25, %v166_v27 }
  0x81   :  { %v90_v28 = vpop.f32.mrf.mxu0  ;;  %v146_v29 = vpop.permute.xlu0 %145 }
  0x82   :  { %v157_v41 = vmul.f32 %v293_v24, %v146_v29 }
  0x83   :  { %v128_v30 = vpop.f32.mrf.mxu1 }
  0x84   :  { %v129_v32 = vadd.f32 %v128_v30, %v90_v28 }
  0x85   :  { %v239_v50 = vpop.permute.xlu1 %238 }
  0x86   :  { %v159_v34 = vadd.f32 %v156_v26, %v129_v32  ;;  %vm244_vm7 = vcmp.eq.s32.totalorder %v239_v50, 1 }
  0x87   :  { %v93_v44 = vpop.f32.mrf.mxu3 }
  0x88   :  { %v184_v37 = vadd.f32 %v181_v31, %v159_v34 }
  0x89   :  { %v219_v38 = vpop.f32.mrf.mxu2  ;;  %v236_v42 = vpop.permute.xlu0 %235 }
  0x8a   :  { %v220_v39 = vadd.f32 %v294_v35, %v219_v38  ;;  %v191_v40 = vadd.f32 %v295_v36, %v184_v37  ;;  %vm243_vm6 = vcmp.eq.s32.totalorder %v236_v42, 1 }
  0x8b   :  { %v131_v43 = vpop.f32.mrf.mxu1 }
  0x8c   :  { %v246_v45 = vsel %vm243_vm6, %v220_v39, %v191_v40  ;;  %v132_v46 = vadd.f32 %v131_v43, %v93_v44 }
  0x8d   :  { %250 = vst.msk [vmem:[#allocation2] sm:$0xff] %vm249_vm5, %v246_v45 }
  0x8e   :  { %v160_v49 = vadd.f32 %v157_v41, %v132_v46 }
  0x8f   :  { %v96_v56 = vpop.f32.mrf.mxu3 }
  0x90   :  { %v185_v51 = vadd.f32 %v182_v47, %v160_v49 }
  0x91   :  { %v222_v52 = vpop.f32.mrf.mxu2 }
  0x92   :  { %v223_v53 = vadd.f32 %v294_v35, %v222_v52  ;;  %v192_v54 = vadd.f32 %v295_v36, %v185_v51 }
  0x93   :  { %v134_v55 = vpop.f32.mrf.mxu1 }
  0x94   :  { %v247_v58 = vsel %vm244_vm7, %v223_v53, %v192_v54  ;;  %v135_v59 = vadd.f32 %v134_v55, %v96_v56 }
  0x95   :  { %251 = vst.msk [vmem:[#allocation2 + $0x8] sm:$0xff] %vm249_vm5, %v247_v58 }
  0x96   :  { %v161_v61 = vadd.f32 %v158_v57, %v135_v59 }
  0x98   :  { %v186_v63 = vadd.f32 %v183_v60, %v161_v61 }
  0x99   :  { %v225_v0 = vpop.f32.mrf.mxu2 }
  0x9a   :  { %v226_v1 = vadd.f32 %v294_v35, %v225_v0  ;;  %v193_v2 = vadd.f32 %v295_v36, %v186_v63 }
  0x9c   :  { %v248_v3 = vsel %vm245_vm9, %v226_v1, %v193_v2 }
  0x9d   :  { %253 = vst.msk [vmem:[#allocation2 + $0x10] sm:$0x3] %vm252_vm8, %v248_v3 }
  0x9e   :  { %266 = dma.vmem_to_hbm [thread:$0]  %s259_s8, 384, %s261_s18, [#allocation3], %s324_s19, %s324_s19, %s325_s20  }
  0x9f   :  { %320 = dma.done.wait [#allocation3], 384  }
  0xa0   :  { %321 = vsyncadd [#allocation3], 4294966912 }
  0xa1   :  { %271 = vsyncpa [#allocation3], 1 }

</bundles_post_ra>
